<compile_context>
chip_gen: v5e
topology: v5e:2x2
jax: 0.10.0
libtpu: 0.0.40
codegen_flags: <defaults>
</compile_context>

<pallas_src>
import jax
import jax.numpy as jnp
from jax.experimental import pallas as pl
from jax.experimental.pallas import tpu as pltpu

BN_EPS = 1e-5
CP = 128  # lane-dense channel / class width

_VMEM_SPEC = pl.BlockSpec(memory_space=pltpu.MemorySpace.VMEM)


# ---------------- JAX glue: im2col (layout plumbing only) ----------------

def _im2col(x, k):
    """NCHW -> (N*OH*OW, Cin*k*k), PyTorch (c, kh, kw) feature order. Reference only."""
    N, C, H, W = x.shape
    OH, OW = H - k + 1, W - k + 1
    cols = [x[:, :, kh:kh + OH, kw:kw + OW] for kh in range(k) for kw in range(k)]
    p = jnp.stack(cols, axis=2)                      # (N, C, k*k, OH, OW)
    p = p.transpose(0, 3, 4, 1, 2).reshape(N * OH * OW, C * k * k)
    return p, OH, OW


def _maxpool_nchw(x, k):
    """nn.MaxPool2d(k) (stride=k, floor mode). Reference only."""
    N, C, H, W = x.shape
    OH, OW = H // k, W // k
    x = x[:, :, :OH * k, :OW * k].reshape(N, C, OH, k, OW, k)
    return x.max(axis=(3, 5))


def _build_patches(x, k):
    """im2col with pool-window-contiguous row ordering.

    Returns:
      core: (PH*PW * N * (k*k)**2, F)  rows ordered (block, sample, window-offset)
      rest: rows for conv positions cropped by the floor-mode pools (still needed for BN stats)
      (OH, OW, PH, PW)
    Feature order is (c, kh, kw), matching Conv2d weight reshape.
    """
    N, C, H, W = x.shape
    OH, OW = H - k + 1, W - k + 1
    F = C * k * k
    cols = [x[:, :, kh:kh + OH, kw:kw + OW] for kh in range(k) for kw in range(k)]
    p = jnp.stack(cols, axis=-1)                                  # (N, C, OH, OW, k*k)
    p = p.transpose(0, 2, 3, 1, 4).reshape(N, OH, OW, F)          # (N, OH, OW, F)

    PS = k * k                                                    # fused pool window/stride
    PH, PW = (OH // k) // k, (OW // k) // k

    core = p[:, :PH * PS, :PW * PS, :]                            # region seen by the pools
    core = core.reshape(N, PH, PS, PW, PS, F)
    core = core.transpose(1, 3, 0, 2, 4, 5)                       # (ph, pw, n, dh, dw, F)
    core = core.reshape(PH * PW * N * PS * PS, F)

    rest = jnp.concatenate(
        [p[:, PH * PS:, :, :].reshape(-1, F),                     # bottom strip
         p[:, :PH * PS, PW * PS:, :].reshape(-1, F)], axis=0)     # right strip
    return core, rest, (OH, OW, PH, PW)


# ---------------- fused forward (single Pallas kernel, no scratch) ----------------

def _make_kernel(N, R_real, nblk, ps2, hidden_dim):
    rows_per_blk = N * ps2

    def fused_kernel(p_ref, wc_ref, g_ref, be_ref,
                     w1_ref, b1_ref, w2_ref, b2_ref, w3_ref, b3_ref, o_ref):
        # ---- conv as im2col matmul: bf16 MXU operands, f32 accumulation ----
        y = jnp.dot(p_ref[...], wc_ref[...], preferred_element_type=jnp.float32)  # (R_pad, CP)

        # ---- BatchNorm2d, training-mode batch stats (exact two-pass) ----
        # Zero-padded rows contribute 0 to the mean sum; mask them out of the var sum.
        # Conv bias is omitted: the mean subtraction cancels any constant bias exactly.
        inv_r = 1.0 / R_real
        mean = jnp.sum(y, axis=0, keepdims=True) * inv_r
        yc = y - mean
        row_id = jax.lax.broadcasted_iota(jnp.int32, yc.shape, 0)
        yc_valid = jnp.where(row_id < R_real, yc, 0.0)
        var = jnp.sum(yc_valid * yc_valid, axis=0, keepdims=True) * inv_r
        scale = g_ref[...] * jax.lax.rsqrt(var + BN_EPS)
        a = jnp.maximum(yc * scale + be_ref[...], 0.0).astype(jnp.bfloat16)        # ReLU

        # ---- MaxPool2d(k) x2 + Flatten, vectorized & lane-compacted ----
        # Channels are replicated across the nblk lane groups in w_conv/gamma/beta, so
        # masking each block's 32-row slab to its own lane group and max-combining the
        # blocks yields f[n, blk*hidden + c] directly (all values are >= 0 after ReLU,
        # non-owned lanes are exactly zero).  No cross-lane shifts, no scratch stores.
        lane_id = jax.lax.broadcasted_iota(jnp.int32, (rows_per_blk, CP), 1)
        acc = None
        for blk in range(nblk):                                   # nblk == 4 (static)
            slab = a[blk * rows_per_blk:(blk + 1) * rows_per_blk, :]
            keep = (lane_id >= blk * hidden_dim) & (lane_id < (blk + 1) * hidden_dim)
            slab = jnp.where(keep, slab, 0.0)
            acc = slab if acc is None else jnp.maximum(acc, slab)
        # rows of acc are (n, window-offset); reduce the ps2 window offsets per sample.
        f = jnp.max(acc.reshape(N, ps2, CP), axis=1)              # (N, CP) bf16, compact lanes

        # ---- FC(ReLU) -> FC(ReLU) -> FC -> LogSoftmax (lane-dense, 128 cols) ----
        h = jnp.dot(f, w1_ref[...], preferred_element_type=jnp.float32) + b1_ref[...]
        h = jnp.maximum(h, 0.0)
        h = jnp.dot(h.astype(jnp.bfloat16), w2_ref[...],
                    preferred_element_type=jnp.float32) + b2_ref[...]
        h = jnp.maximum(h, 0.0)
        logits = jnp.dot(h.astype(jnp.bfloat16), w3_ref[...],
                         preferred_element_type=jnp.float32) + b3_ref[...]
        # padded class columns carry bias -1e30 -> exp underflows to 0, softmax unaffected
        m = jnp.max(logits, axis=1, keepdims=True)
        lse = m + jnp.log(jnp.sum(jnp.exp(logits - m), axis=1, keepdims=True))
        o_ref[...] = logits - lse

    return fused_kernel


def simple_model_forward(x, packed, kernel_size, num_classes, hidden_dim):
    N = x.shape[0]
    k = kernel_size

    core, rest, (OH, OW, PH, PW) = _build_patches(x, k)
    nblk = PH * PW
    ps2 = (k * k) ** 2
    assert nblk == 4, "Flatten must yield 4*hidden features (model contract)"
    assert nblk * hidden_dim <= CP, "TODO(synk): support hidden_dim > 32 (multi-slab flatten)"

    F = core.shape[1]
    Fp = packed["w_conv"].shape[0]                    # padded to multiple of 16 (bf16 packing)
    R_pool = core.shape[0]                            # N * nblk * ps2
    R_real = N * OH * OW
    R_pad = ((R_real + 15) // 16) * 16                # bf16 sublane-tile multiple

    # one padded bf16 buffer (pad + cast fused into its construction)
    patches = jnp.zeros((R_pad, Fp), jnp.bfloat16)
    patches = patches.at[:R_pool, :F].set(core.astype(jnp.bfloat16))
    patches = patches.at[R_pool:R_real, :F].set(rest.astype(jnp.bfloat16))

    kernel = _make_kernel(N, R_real, nblk, ps2, hidden_dim)

    cost = pl.CostEstimate(
        flops=2 * R_pad * Fp * CP + 3 * 2 * N * CP * CP + 12 * R_pad * CP,
        transcendentals=CP + 2 * N * CP,
        bytes_accessed=(R_pad * Fp * 2 + Fp * CP * 2 + 3 * CP * CP * 2
                        + 6 * CP * 4 + N * CP * 4),
    )

    out = pl.pallas_call(
        kernel,
        out_shape=jax.ShapeDtypeStruct((N, CP), jnp.float32),
        in_specs=[_VMEM_SPEC] * 10,
        out_specs=_VMEM_SPEC,
        compiler_params=pltpu.CompilerParams(vmem_limit_bytes=32 * 1024 * 1024),
        cost_estimate=cost,
    )(patches, packed["w_conv"], packed["bn_gamma"], packed["bn_beta"],
      packed["w1"], packed["b1"], packed["w2"], packed["b2"],
      packed["w3"], packed["b3"])

    return out[:, :num_classes]


# ---------------- parameters: PyTorch-equivalent init + kernel-layout packing ----------------

def init_params(key, in_dim, hidden_dim, kernel_size, num_classes):
    """Raw PyTorch-shaped params (weights stored (in, out)). Conv bias omitted: training-mode
    BatchNorm subtracts the per-channel batch mean, which cancels any constant bias exactly."""
    ks = jax.random.split(key, 7)

    def u(k_, shape, fan_in):
        bound = 1.0 / (fan_in ** 0.5)
        return jax.random.uniform(k_, shape, jnp.float32, -bound, bound)

    F = in_dim * kernel_size * kernel_size
    d1 = 4 * hidden_dim
    return dict(
        w_conv=u(ks[0], (F, hidden_dim), F),
        bn_gamma=jnp.ones((1, hidden_dim), jnp.float32),
        bn_beta=jnp.zeros((1, hidden_dim), jnp.float32),
        w1=u(ks[1], (d1, hidden_dim), d1), b1=u(ks[2], (1, hidden_dim), d1),
        w2=u(ks[3], (hidden_dim, hidden_dim), hidden_dim),
        b2=u(ks[4], (1, hidden_dim), hidden_dim),
        w3=u(ks[5], (hidden_dim, num_classes), hidden_dim),
        b3=u(ks[6], (1, num_classes), hidden_dim),
    )


def pack_params(raw, in_dim, hidden_dim, kernel_size, num_classes, nblk=4):
    """Pad to lane-dense (128) layouts.  Conv weights / gamma / beta are REPLICATED across the
    nblk lane groups (these lanes were zero padding anyway) so the kernel can build the
    flattened features by lane-group masking instead of cross-lane shifts.  w1 is packed as a
    compact (128, 128) matrix with rows [blk*hidden + c] <- torch flatten index (c*nblk + blk).
    MXU weights are stored bf16; biases / BN params stay f32."""
    assert nblk * hidden_dim <= CP
    F = in_dim * kernel_size * kernel_size
    Fp = ((F + 15) // 16) * 16                        # bf16 packs 16 rows per sublane tile

    wc = jnp.zeros((Fp, CP), jnp.float32)
    g = jnp.zeros((1, CP), jnp.float32)
    be = jnp.zeros((1, CP), jnp.float32)
    w1 = jnp.zeros((CP, CP), jnp.float32)
    for blk in range(nblk):
        lo = blk * hidden_dim
        wc = wc.at[:F, lo:lo + hidden_dim].set(raw["w_conv"])
        g = g.at[:, lo:lo + hidden_dim].set(raw["bn_gamma"])
        be = be.at[:, lo:lo + hidden_dim].set(raw["bn_beta"])
        w1 = w1.at[lo:lo + hidden_dim, :hidden_dim].set(raw["w1"][blk::nblk, :])

    b1 = jnp.zeros((1, CP), jnp.float32).at[:, :hidden_dim].set(raw["b1"])
    w2 = jnp.zeros((CP, CP), jnp.float32).at[:hidden_dim, :hidden_dim].set(raw["w2"])
    b2 = jnp.zeros((1, CP), jnp.float32).at[:, :hidden_dim].set(raw["b2"])
    w3 = jnp.zeros((CP, CP), jnp.float32).at[:hidden_dim, :num_classes].set(raw["w3"])
    # padded class columns get -1e30 so they vanish from the log-softmax denominator
    b3 = jnp.full((1, CP), -1e30, jnp.float32).at[:, :num_classes].set(raw["b3"])

    return dict(
        w_conv=wc.astype(jnp.bfloat16), bn_gamma=g, bn_beta=be,
        w1=w1.astype(jnp.bfloat16), b1=b1,
        w2=w2.astype(jnp.bfloat16), b2=b2,
        w3=w3.astype(jnp.bfloat16), b3=b3,
    )


# ---------------- pure-JAX f32 reference (semantics check) ----------------

def reference_forward(x, raw, k):
    patches, OH, OW = _im2col(x, k)
    y = patches @ raw["w_conv"]
    mean = y.mean(0, keepdims=True)
    var = ((y - mean) ** 2).mean(0, keepdims=True)            # biased, like torch training BN
    y = (y - mean) * jax.lax.rsqrt(var + BN_EPS) * raw["bn_gamma"] + raw["bn_beta"]
    y = jnp.maximum(y, 0.0)
    N = x.shape[0]
    C = y.shape[1]
    y = y.reshape(N, OH, OW, C).transpose(0, 3, 1, 2)         # NCHW for torch Flatten order
    y = _maxpool_nchw(y, k)
    y = _maxpool_nchw(y, k)
    f = y.reshape(N, -1)
    h = jnp.maximum(f @ raw["w1"] + raw["b1"], 0.0)
    h = jnp.maximum(h @ raw["w2"] + raw["b2"], 0.0)
    logits = h @ raw["w3"] + raw["b3"]
    m = logits.max(1, keepdims=True)
    return logits - (m + jnp.log(jnp.exp(logits - m).sum(1, keepdims=True)))


if __name__ == "__main__":
    # spatial 10, k=2: conv -> 9x9, pool -> 4x4, pool -> 2x2 => Flatten gives 4*hidden_dim.
    in_dim, hidden_dim, kernel_size, num_classes = 3, 16, 2, 10
    N, S = 2, 10

    key = jax.random.PRNGKey(0)
    kx, kp = jax.random.split(key)
    x = jax.random.normal(kx, (N, in_dim, S, S), jnp.float32)
    raw = init_params(kp, in_dim, hidden_dim, kernel_size, num_classes)
    packed = pack_params(raw, in_dim, hidden_dim, kernel_size, num_classes)

    fwd = jax.jit(lambda xx: simple_model_forward(xx, packed, kernel_size,
                                                  num_classes, hidden_dim))
    out = fwd(x)
    jax.block_until_ready(out)

    assert out.shape == (N, num_classes)
    # log-softmax sanity: probabilities sum to 1 per row
    assert jnp.allclose(jnp.exp(out).sum(axis=1), 1.0, atol=1e-4)
    # semantics check vs. pure-JAX f32 reference (loose tol: bf16 MXU operands)
    ref = reference_forward(x, raw, kernel_size)
    err = float(jnp.max(jnp.abs(out - ref)))
    assert err < 5e-2, err
    print("KERNEL_OK")
</pallas_src>

<mosaic_0001>
module attributes {stable_mosaic.version = 11 : i64} {
  func.func @fused_kernel(%arg0: memref<176x16xbf16, #tpu.memory_space<vmem>>, %arg1: memref<16x128xbf16, #tpu.memory_space<vmem>>, %arg2: memref<1x128xf32, #tpu.memory_space<vmem>>, %arg3: memref<1x128xf32, #tpu.memory_space<vmem>>, %arg4: memref<128x128xbf16, #tpu.memory_space<vmem>>, %arg5: memref<1x128xf32, #tpu.memory_space<vmem>>, %arg6: memref<128x128xbf16, #tpu.memory_space<vmem>>, %arg7: memref<1x128xf32, #tpu.memory_space<vmem>>, %arg8: memref<128x128xbf16, #tpu.memory_space<vmem>>, %arg9: memref<1x128xf32, #tpu.memory_space<vmem>>, %arg10: memref<2x128xf32, #tpu.memory_space<vmem>>) attributes {dimension_semantics = [], scalar_prefetch = 0 : i64, scratch_operands = 0 : i64, tpu.core_type = #tpu.core_type<tc>} {
    %c0 = arith.constant 0 : index
    %c0_0 = arith.constant 0 : index
    %0 = vector.load %arg0[%c0, %c0_0] : memref<176x16xbf16, #tpu.memory_space<vmem>>, vector<176x16xbf16>
    %c0_1 = arith.constant 0 : index
    %c0_2 = arith.constant 0 : index
    %1 = vector.load %arg1[%c0_1, %c0_2] : memref<16x128xbf16, #tpu.memory_space<vmem>>, vector<16x128xbf16>
    %cst = arith.constant dense<0.000000e+00> : vector<176x128xf32>
    %2 = tpu.matmul %0, %1, %cst {dimension_numbers = #tpu.dot_dimension_numbers<[1], [0], [0], [1], [0, 0, 1, 1], [], []>} : vector<176x16xbf16>, vector<16x128xbf16>, vector<176x128xf32> -> vector<176x128xf32>
    %cst_3 = arith.constant dense<0.000000e+00> : vector<128xf32>
    %3 = vector.multi_reduction <add>, %2, %cst_3 [0] : vector<176x128xf32> to vector<128xf32>
    %4 = vector.shape_cast %3 : vector<128xf32> to vector<1x128xf32>
    %cst_4 = arith.constant 0.00617283955 : f32
    %5 = vector.broadcast %cst_4 : f32 to vector<1x128xf32>
    %6 = arith.mulf %4, %5 : vector<1x128xf32>
    %7 = vector.broadcast %6 : vector<1x128xf32> to vector<176x128xf32>
    %8 = arith.subf %2, %7 : vector<176x128xf32>
    %9 = tpu.iota {dimensions = array<i32: 0>} : vector<176x128xi32>
    %c162_i32 = arith.constant 162 : i32
    %10 = vector.broadcast %c162_i32 : i32 to vector<176x128xi32>
    %11 = arith.cmpi slt, %9, %10 : vector<176x128xi32>
    %cst_5 = arith.constant 0.000000e+00 : f32
    %12 = vector.broadcast %cst_5 : f32 to vector<176x128xf32>
    %13 = arith.select %11, %8, %12 : vector<176x128xi1>, vector<176x128xf32>
    %14 = arith.mulf %13, %13 : vector<176x128xf32>
    %cst_6 = arith.constant dense<0.000000e+00> : vector<128xf32>
    %15 = vector.multi_reduction <add>, %14, %cst_6 [0] : vector<176x128xf32> to vector<128xf32>
    %16 = vector.shape_cast %15 : vector<128xf32> to vector<1x128xf32>
    %cst_7 = arith.constant 0.00617283955 : f32
    %17 = vector.broadcast %cst_7 : f32 to vector<1x128xf32>
    %18 = arith.mulf %16, %17 : vector<1x128xf32>
    %c0_8 = arith.constant 0 : index
    %c0_9 = arith.constant 0 : index
    %19 = vector.load %arg2[%c0_8, %c0_9] : memref<1x128xf32, #tpu.memory_space<vmem>>, vector<1x128xf32>
    %cst_10 = arith.constant 9.99999974E-6 : f32
    %20 = vector.broadcast %cst_10 : f32 to vector<1x128xf32>
    %21 = arith.addf %18, %20 : vector<1x128xf32>
    %22 = math.rsqrt %21 : vector<1x128xf32>
    %23 = arith.mulf %19, %22 : vector<1x128xf32>
    %24 = vector.broadcast %23 : vector<1x128xf32> to vector<176x128xf32>
    %25 = arith.mulf %8, %24 : vector<176x128xf32>
    %c0_11 = arith.constant 0 : index
    %c0_12 = arith.constant 0 : index
    %26 = vector.load %arg3[%c0_11, %c0_12] : memref<1x128xf32, #tpu.memory_space<vmem>>, vector<1x128xf32>
    %27 = vector.broadcast %26 : vector<1x128xf32> to vector<176x128xf32>
    %28 = arith.addf %25, %27 : vector<176x128xf32>
    %cst_13 = arith.constant 0.000000e+00 : f32
    %29 = vector.broadcast %cst_13 : f32 to vector<176x128xf32>
    %30 = arith.maximumf %28, %29 : vector<176x128xf32>
    %31 = arith.truncf %30 : vector<176x128xf32> to vector<176x128xbf16>
    %32 = tpu.iota {dimensions = array<i32: 1>} : vector<32x128xi32>
    %33 = vector.extract_strided_slice %31 {offsets = [0, 0], sizes = [32, 128], strides = [1, 1]} : vector<176x128xbf16> to vector<32x128xbf16>
    %c0_i32 = arith.constant 0 : i32
    %34 = vector.broadcast %c0_i32 : i32 to vector<32x128xi32>
    %35 = arith.cmpi sge, %32, %34 : vector<32x128xi32>
    %c16_i32 = arith.constant 16 : i32
    %36 = vector.broadcast %c16_i32 : i32 to vector<32x128xi32>
    %37 = arith.cmpi slt, %32, %36 : vector<32x128xi32>
    %38 = arith.andi %35, %37 : vector<32x128xi1>
    %cst_14 = arith.constant 0.000000e+00 : f32
    %39 = arith.truncf %cst_14 : f32 to bf16
    %40 = vector.broadcast %39 : bf16 to vector<32x128xbf16>
    %41 = arith.select %38, %33, %40 : vector<32x128xi1>, vector<32x128xbf16>
    %42 = vector.extract_strided_slice %31 {offsets = [32, 0], sizes = [32, 128], strides = [1, 1]} : vector<176x128xbf16> to vector<32x128xbf16>
    %c16_i32_15 = arith.constant 16 : i32
    %43 = vector.broadcast %c16_i32_15 : i32 to vector<32x128xi32>
    %44 = arith.cmpi sge, %32, %43 : vector<32x128xi32>
    %c32_i32 = arith.constant 32 : i32
    %45 = vector.broadcast %c32_i32 : i32 to vector<32x128xi32>
    %46 = arith.cmpi slt, %32, %45 : vector<32x128xi32>
    %47 = arith.andi %44, %46 : vector<32x128xi1>
    %cst_16 = arith.constant 0.000000e+00 : f32
    %48 = arith.truncf %cst_16 : f32 to bf16
    %49 = vector.broadcast %48 : bf16 to vector<32x128xbf16>
    %50 = arith.select %47, %42, %49 : vector<32x128xi1>, vector<32x128xbf16>
    %51 = arith.maximumf %41, %50 : vector<32x128xbf16>
    %52 = vector.extract_strided_slice %31 {offsets = [64, 0], sizes = [32, 128], strides = [1, 1]} : vector<176x128xbf16> to vector<32x128xbf16>
    %c32_i32_17 = arith.constant 32 : i32
    %53 = vector.broadcast %c32_i32_17 : i32 to vector<32x128xi32>
    %54 = arith.cmpi sge, %32, %53 : vector<32x128xi32>
    %c48_i32 = arith.constant 48 : i32
    %55 = vector.broadcast %c48_i32 : i32 to vector<32x128xi32>
    %56 = arith.cmpi slt, %32, %55 : vector<32x128xi32>
    %57 = arith.andi %54, %56 : vector<32x128xi1>
    %cst_18 = arith.constant 0.000000e+00 : f32
    %58 = arith.truncf %cst_18 : f32 to bf16
    %59 = vector.broadcast %58 : bf16 to vector<32x128xbf16>
    %60 = arith.select %57, %52, %59 : vector<32x128xi1>, vector<32x128xbf16>
    %61 = arith.maximumf %51, %60 : vector<32x128xbf16>
    %62 = vector.extract_strided_slice %31 {offsets = [96, 0], sizes = [32, 128], strides = [1, 1]} : vector<176x128xbf16> to vector<32x128xbf16>
    %c48_i32_19 = arith.constant 48 : i32
    %63 = vector.broadcast %c48_i32_19 : i32 to vector<32x128xi32>
    %64 = arith.cmpi sge, %32, %63 : vector<32x128xi32>
    %c64_i32 = arith.constant 64 : i32
    %65 = vector.broadcast %c64_i32 : i32 to vector<32x128xi32>
    %66 = arith.cmpi slt, %32, %65 : vector<32x128xi32>
    %67 = arith.andi %64, %66 : vector<32x128xi1>
    %cst_20 = arith.constant 0.000000e+00 : f32
    %68 = arith.truncf %cst_20 : f32 to bf16
    %69 = vector.broadcast %68 : bf16 to vector<32x128xbf16>
    %70 = arith.select %67, %62, %69 : vector<32x128xi1>, vector<32x128xbf16>
    %71 = arith.maximumf %61, %70 : vector<32x128xbf16>
    %72 = vector.shape_cast %71 : vector<32x128xbf16> to vector<2x16x128xbf16>
    %cst_21 = arith.constant dense<0xFF80> : vector<2x128xbf16>
    %73 = vector.multi_reduction <maximumf>, %72, %cst_21 [1] : vector<2x16x128xbf16> to vector<2x128xbf16>
    %c0_22 = arith.constant 0 : index
    %c0_23 = arith.constant 0 : index
    %74 = vector.load %arg4[%c0_22, %c0_23] : memref<128x128xbf16, #tpu.memory_space<vmem>>, vector<128x128xbf16>
    %cst_24 = arith.constant dense<0.000000e+00> : vector<2x128xf32>
    %75 = tpu.matmul %73, %74, %cst_24 {dimension_numbers = #tpu.dot_dimension_numbers<[1], [0], [0], [1], [0, 0, 1, 1], [], []>} : vector<2x128xbf16>, vector<128x128xbf16>, vector<2x128xf32> -> vector<2x128xf32>
    %c0_25 = arith.constant 0 : index
    %c0_26 = arith.constant 0 : index
    %76 = vector.load %arg5[%c0_25, %c0_26] : memref<1x128xf32, #tpu.memory_space<vmem>>, vector<1x128xf32>
    %77 = vector.broadcast %76 : vector<1x128xf32> to vector<2x128xf32>
    %78 = arith.addf %75, %77 : vector<2x128xf32>
    %cst_27 = arith.constant 0.000000e+00 : f32
    %79 = vector.broadcast %cst_27 : f32 to vector<2x128xf32>
    %80 = arith.maximumf %78, %79 : vector<2x128xf32>
    %81 = arith.truncf %80 : vector<2x128xf32> to vector<2x128xbf16>
    %c0_28 = arith.constant 0 : index
    %c0_29 = arith.constant 0 : index
    %82 = vector.load %arg6[%c0_28, %c0_29] : memref<128x128xbf16, #tpu.memory_space<vmem>>, vector<128x128xbf16>
    %cst_30 = arith.constant dense<0.000000e+00> : vector<2x128xf32>
    %83 = tpu.matmul %81, %82, %cst_30 {dimension_numbers = #tpu.dot_dimension_numbers<[1], [0], [0], [1], [0, 0, 1, 1], [], []>} : vector<2x128xbf16>, vector<128x128xbf16>, vector<2x128xf32> -> vector<2x128xf32>
    %c0_31 = arith.constant 0 : index
    %c0_32 = arith.constant 0 : index
    %84 = vector.load %arg7[%c0_31, %c0_32] : memref<1x128xf32, #tpu.memory_space<vmem>>, vector<1x128xf32>
    %85 = vector.broadcast %84 : vector<1x128xf32> to vector<2x128xf32>
    %86 = arith.addf %83, %85 : vector<2x128xf32>
    %cst_33 = arith.constant 0.000000e+00 : f32
    %87 = vector.broadcast %cst_33 : f32 to vector<2x128xf32>
    %88 = arith.maximumf %86, %87 : vector<2x128xf32>
    %89 = arith.truncf %88 : vector<2x128xf32> to vector<2x128xbf16>
    %c0_34 = arith.constant 0 : index
    %c0_35 = arith.constant 0 : index
    %90 = vector.load %arg8[%c0_34, %c0_35] : memref<128x128xbf16, #tpu.memory_space<vmem>>, vector<128x128xbf16>
    %cst_36 = arith.constant dense<0.000000e+00> : vector<2x128xf32>
    %91 = tpu.matmul %89, %90, %cst_36 {dimension_numbers = #tpu.dot_dimension_numbers<[1], [0], [0], [1], [0, 0, 1, 1], [], []>} : vector<2x128xbf16>, vector<128x128xbf16>, vector<2x128xf32> -> vector<2x128xf32>
    %c0_37 = arith.constant 0 : index
    %c0_38 = arith.constant 0 : index
    %92 = vector.load %arg9[%c0_37, %c0_38] : memref<1x128xf32, #tpu.memory_space<vmem>>, vector<1x128xf32>
    %93 = vector.broadcast %92 : vector<1x128xf32> to vector<2x128xf32>
    %94 = arith.addf %91, %93 : vector<2x128xf32>
    %cst_39 = arith.constant dense<0xFF800000> : vector<2xf32>
    %95 = vector.multi_reduction <maximumf>, %94, %cst_39 [1] : vector<2x128xf32> to vector<2xf32>
    %96 = vector.shape_cast %95 : vector<2xf32> to vector<2x1xf32>
    %97 = vector.broadcast %96 : vector<2x1xf32> to vector<2x128xf32>
    %98 = arith.subf %94, %97 : vector<2x128xf32>
    %99 = math.exp %98 : vector<2x128xf32>
    %cst_40 = arith.constant dense<0.000000e+00> : vector<2xf32>
    %100 = vector.multi_reduction <add>, %99, %cst_40 [1] : vector<2x128xf32> to vector<2xf32>
    %101 = vector.shape_cast %100 : vector<2xf32> to vector<2x1xf32>
    %102 = math.log %101 : vector<2x1xf32>
    %103 = arith.addf %96, %102 : vector<2x1xf32>
    %104 = vector.broadcast %103 : vector<2x1xf32> to vector<2x128xf32>
    %105 = arith.subf %94, %104 : vector<2x128xf32>
    %c0_41 = arith.constant 0 : index
    %c0_42 = arith.constant 0 : index
    %106 = vector.load %arg10[%c0_41, %c0_42] : memref<2x128xf32, #tpu.memory_space<vmem>>, vector<2x128xf32>
    tpu.vector_store %arg10[%c0_41, %c0_42], %105 {strides = array<i32>} : memref<2x128xf32, #tpu.memory_space<vmem>>, vector<2x128xf32>,
    return
  }
}

</mosaic_0001>

<bundles_post_ra>
// kernel: _lambda_.1
= control target key start
LH: loop header
LB: loop body
LE: loop exit
PB: predicated region body
PF: predicated region fallthrough
CT: control target
= control target key end

     0   :  { %vm122_vm0 = vcmask 130048   ;;  %s1541_s0 = inlined_call_operand.vmem [shape: bf16[176,16], index: 0, kind: input, shape index: {}]   ;;  %s1542_s1 = inlined_call_operand.vmem [shape: bf16[16,128], index: 1, kind: input, shape index: {}]   ;;  %s1543_s2 = inlined_call_operand.vmem [shape: f32[1,128], index: 2, kind: input, shape index: {}]   ;;  %s1544_s3 = inlined_call_operand.vmem [shape: f32[1,128], index: 3, kind: input, shape index: {}]   ;;  %s1545_s4 = inlined_call_operand.vmem [shape: bf16[128,128], index: 4, kind: input, shape index: {}]   ;;  %s1546_s5 = inlined_call_operand.vmem [shape: f32[1,128], index: 5, kind: input, shape index: {}]   ;;  %s1547_s6 = inlined_call_operand.vmem [shape: bf16[128,128], index: 6, kind: input, shape index: {}]   ;;  %s1548_s7 = inlined_call_operand.vmem [shape: f32[1,128], index: 7, kind: input, shape index: {}]   ;;  %s1549_s8 = inlined_call_operand.vmem [shape: bf16[128,128], index: 8, kind: input, shape index: {}]   ;;  %s1550_s9 = inlined_call_operand.vmem [shape: f32[1,128], index: 9, kind: input, shape index: {}]   ;;  %s1551_s10 = inlined_call_operand.hbm [shape: f32[2,128], index: 10, kind: output, shape index: {}]  }
   0x1   :  { %v1025_v0 = vld [vmem:[%s1542_s1] sm:$0xff] }
   0x2   :  { %v1014_v1 = vld [vmem:[%s1541_s0] sm:$0xff]  ;;  %163 = vmatpush.bf16.msra.mxu0 %v1025_v0  ;;  %1050 = vmatpush.bf16.msra.mxu1 %v1025_v0 }
   0x3   :  { %15 = vsyncpa [#allocation3], 0  ;;  %1051 = vmatpush.bf16.msra.mxu2 %v1025_v0  ;;  %v1019_v2 = vld [vmem:[%s1541_s0 + $0x28] sm:$0xff]  ;;  %v1022_v3 = vld [vmem:[%s1541_s0 + $0x40] sm:$0xff]  ;;  %s850_s21 = sshll.u32 %s1551_s10, 4  ;;  %s851_s21 = int_to_ptr.hbm [resolvable:$true] %s850_s21 }
   0x4   :  { %v1015_v4 = vld [vmem:[%s1541_s0 + $0x8] sm:$0xff]  ;;  %v1020_v5 = vld [vmem:[%s1541_s0 + $0x30] sm:$0xff]  ;;  %v1021_v8 = vld [vmem:[%s1541_s0 + $0x38] sm:$0xff] }
   0x5   :  { %907 = vmatmul.msk.bf16.vlgmr.msra.gmra.mxu0 %vm122_vm0, %v1014_v1  ;;  %912 = vmatmul.msk.bf16.vlgmr.msra.gmra.mxu1 %vm122_vm0, %v1019_v2  ;;  %v1023_v6 = vld [vmem:[%s1541_s0 + $0x48] sm:$0xff]  ;;  %v1016_v7 = vld [vmem:[%s1541_s0 + $0x10] sm:$0xff]  ;;  %v1017_v10 = vld [vmem:[%s1541_s0 + $0x18] sm:$0xff] }
   0x6   :  { %915 = vmatmul.msk.bf16.vlgmr.msra.gmra.mxu2 %vm122_vm0, %v1022_v3  ;;  %v1024_v9 = vld [vmem:[%s1541_s0 + $0x50] sm:$0xff]  ;;  %v1018_v11 = vld [vmem:[%s1541_s0 + $0x20] sm:$0xff]  ;;  %v1033_v43 = vld [vmem:[%s1545_s4 + $0x38] sm:$0xff] }
   0x7   :  { %649 = vmatpush.bf16.msrb.mxu1 %v1033_v43  ;;  %v1032_v45 = vld [vmem:[%s1545_s4 + $0x30] sm:$0xff]  ;;  %v1031_v49 = vld [vmem:[%s1545_s4 + $0x28] sm:$0xff]  ;;  %v1030_v53 = vld [vmem:[%s1545_s4 + $0x20] sm:$0xff] }
   0x8   :  { %v1029_v56 = vld [vmem:[%s1545_s4 + $0x18] sm:$0xff]  ;;  %v1028_v60 = vld [vmem:[%s1545_s4 + $0x10] sm:$0xff]  ;;  %v1027_v63 = vld [vmem:[%s1545_s4 + $0x8] sm:$0xff] }
   0x9   :  { %v1026_v2 = vld [vmem:[%s1545_s4] sm:$0xff] }
   0xb   :  { %650 = vmatpush.bf16.msrb.mxu1 %v1032_v45 }
   0xf   :  { %651 = vmatpush.bf16.msrb.mxu1 %v1031_v49  ;;  %v270_v49 = vlaneseq }
  0x13   :  { %652 = vmatpush.bf16.msrb.mxu1 %v1030_v53 }
  0x15   :  { %908 = vmatmul.msk.bf16.gmra.mxu0 %vm122_vm0, %v1015_v4  ;;  %913 = vmatmul.msk.bf16.gmra.mxu1 %vm122_vm0, %v1020_v5 }
  0x16   :  { %916 = vmatmul.msk.bf16.gmra.mxu2 %vm122_vm0, %v1023_v6 }
  0x17   :  { %653 = vmatpush.bf16.msrb.mxu1 %v1029_v56 }
  0x1b   :  { %654 = vmatpush.bf16.msrb.mxu1 %v1028_v60 }
  0x1f   :  { %655 = vmatpush.bf16.msrb.mxu1 %v1027_v63 }
  0x23   :  { %656 = vmatpush.bf16.msrb.mxu1 %v1026_v2 }
  0x25   :  { %909 = vmatmul.msk.bf16.gmra.mxu0 %vm122_vm0, %v1016_v7  ;;  %914 = vmatmul.msk.bf16.gmra.mxu1 %vm122_vm0, %v1021_v8 }
  0x26   :  { %917 = vmatmul.msk.bf16.gmra.mxu2 %vm122_vm0, %v1024_v9 }
  0x35   :  { %910 = vmatmul.msk.bf16.gmra.mxu0 %vm122_vm0, %v1017_v10 }
  0x45   :  { %911 = vmatmul.msk.bf16.gmra.mxu0 %vm122_vm0, %v1018_v11 }
  0x82   :  { %v1192_v12 = vpop.f32.mrf.mxu0  ;;  %v1202_v17 = vpop.f32.mrf.mxu1 }
  0x89   :  { %v1208_v20 = vpop.f32.mrf.mxu2 }
  0x8a   :  { %v1194_v13 = vpop.f32.mrf.mxu0  ;;  %v1206_v19 = vpop.f32.mrf.mxu1 }
  0x8b   :  { %v220_v25 = vadd.f32 %v1194_v13, %v1192_v12 }
  0x91   :  { %v1216_v24 = vpop.f32.mrf.mxu2 }
  0x92   :  { %v1196_v14 = vpop.f32.mrf.mxu0  ;;  %v1212_v22 = vpop.f32.mrf.mxu1 }
  0x93   :  { %v221_v26 = vadd.f32 %v220_v25, %v1196_v14 }
  0x99   :  { %v1228_v32 = vpop.f32.mrf.mxu2 }
  0x9a   :  { %v1198_v15 = vpop.f32.mrf.mxu0  ;;  %v1223_v29 = vpop.f32.mrf.mxu1 }
  0x9b   :  { %v222_v27 = vadd.f32 %v221_v26, %v1198_v15 }
  0xa1   :  { %v1239_v40 = vpop.f32.mrf.mxu2 }
  0xa2   :  { %v1200_v16 = vpop.f32.mrf.mxu0  ;;  %v1236_v38 = vpop.f32.mrf.mxu1 }
  0xa3   :  { %v223_v28 = vadd.f32 %v222_v27, %v1200_v16 }
  0xa9   :  { %v1257_v50 = vpop.f32.mrf.mxu2 }
  0xaa   :  { %v1204_v18 = vpop.f32.mrf.mxu0  ;;  %v1251_v47 = vpop.f32.mrf.mxu1 }
  0xab   :  { %v224_v31 = vadd.f32 %v223_v28, %v1204_v18 }
  0xb1   :  { %v217_v58 = vpop.f32.mrf.mxu2 }
  0xb2   :  { %v1210_v21 = vpop.f32.mrf.mxu0 }
  0xb3   :  { %v225_v33 = vadd.f32 %v224_v31, %v1210_v21 }
  0xba   :  { %v1214_v23 = vpop.f32.mrf.mxu0 }
  0xbb   :  { %v226_v34 = vadd.f32 %v225_v33, %v1214_v23 }
  0xc2   :  { %v1225_v30 = vpop.f32.mrf.mxu0 }
  0xc3   :  { %v227_v35 = vadd.f32 %v226_v34, %v1225_v30 }
  0xca   :  { %v1233_v36 = vpop.f32.mrf.mxu0 }
  0xcb   :  { %v228_v37 = vadd.f32 %v227_v35, %v1233_v36 }
  0xcd   :  { %v229_v39 = vadd.f32 %v228_v37, %v1202_v17 }
  0xcf   :  { %v230_v41 = vadd.f32 %v229_v39, %v1206_v19 }
  0xd1   :  { %v231_v42 = vadd.f32 %v230_v41, %v1212_v22 }
  0xd3   :  { %v232_v44 = vadd.f32 %v231_v42, %v1223_v29 }
  0xd5   :  { %v233_v46 = vadd.f32 %v232_v44, %v1236_v38 }
  0xd7   :  { %v234_v48 = vadd.f32 %v233_v46, %v1251_v47 }
  0xd9   :  { %v235_v51 = vadd.f32 %v234_v48, %v1208_v20 }
  0xdb   :  { %v236_v52 = vadd.f32 %v235_v51, %v1216_v24 }
  0xdd   :  { %v237_v54 = vadd.f32 %v236_v52, %v1228_v32 }
  0xdf   :  { %v238_v55 = vadd.f32 %v237_v54, %v1239_v40 }
  0xe1   :  { %v239_v57 = vadd.f32 %v238_v55, %v1257_v50  ;;  %v271_v55 = vshrl.u32 %v270_v49, 7 }
  0xe3   :  { %v240_v59 = vadd.f32 %v239_v57, %v217_v58  ;;  %v291_v60 = vadd.s32 160, %v271_v55 }
  0xe5   :  { %v241_v61 = vrot.slane %v240_v59, 4  ;;  %vm313_vm1 = vcmp.lt.s32.totalorder %v291_v60, 162 }
  0xe7   :  { %v242_v62 = vadd.f32 %v241_v61, %v240_v59 }
  0xe9   :  { %v243_v0 = vrot.slane %v242_v62, 2 }
  0xeb   :  { %v244_v1 = vadd.f32 %v243_v0, %v242_v62 }
  0xed   :  { %v245_v3 = vrot.slane %v244_v1, 1 }
  0xef   :  { %v246_v4 = vadd.f32 %v245_v3, %v244_v1 }
  0xf1   :  { %v1279_v5 = vmul.f32 0.0061728396, %v246_v4 }
  0xf3   :  { %v1283_v6 = vsub.f32 %v1192_v12, %v1279_v5  ;;  %v1287_v7 = vsub.f32 %v1194_v13, %v1279_v5  ;;  %v1291_v8 = vsub.f32 %v1196_v14, %v1279_v5  ;;  %v1299_v11 = vsub.f32 %v1198_v15, %v1279_v5 }
  0xf4   :  { %v1303_v12 = vsub.f32 %v1200_v16, %v1279_v5  ;;  %v1309_v14 = vsub.f32 %v1204_v18, %v1279_v5  ;;  %v1315_v15 = vsub.f32 %v1210_v21, %v1279_v5  ;;  %v1321_v31 = vsub.f32 %v1214_v23, %v1279_v5 }
  0xf5   :  { %v337_v9 = vmul.f32 %v1283_v6, %v1283_v6  ;;  %v338_v10 = vmul.f32 %v1287_v7, %v1287_v7  ;;  %v339_v13 = vmul.f32 %v1291_v8, %v1291_v8  ;;  %v340_v26 = vmul.f32 %v1299_v11, %v1299_v11 }
  0xf6   :  { %v341_v16 = vmul.f32 %v1303_v12, %v1303_v12  ;;  %v342_v18 = vmul.f32 %v1309_v14, %v1309_v14  ;;  %v1327_v34 = vsub.f32 %v1225_v30, %v1279_v5  ;;  %v343_v21 = vmul.f32 %v1315_v15, %v1315_v15 }
  0xf7   :  { %v359_v25 = vadd.f32 %v338_v10, %v337_v9  ;;  %v1333_v37 = vsub.f32 %v1233_v36, %v1279_v5  ;;  %v344_v23 = vmul.f32 %v1321_v31, %v1321_v31  ;;  %v1339_v41 = vsub.f32 %v1202_v17, %v1279_v5 }
  0xf8   :  { %v345_v30 = vmul.f32 %v1327_v34, %v1327_v34  ;;  %v1345_v43 = vsub.f32 %v1206_v19, %v1279_v5  ;;  %v1351_v45 = vsub.f32 %v1212_v22, %v1279_v5  ;;  %v1357_v48 = vsub.f32 %v1223_v29, %v1279_v5 }
  0xf9   :  { %v360_v27 = vadd.f32 %v359_v25, %v339_v13  ;;  %v346_v36 = vmul.f32 %v1333_v37, %v1333_v37  ;;  %v347_v17 = vmul.f32 %v1339_v41, %v1339_v41  ;;  %v1363_v52 = vsub.f32 %v1236_v38, %v1279_v5 }
  0xfa   :  { %v348_v19 = vmul.f32 %v1345_v43, %v1345_v43  ;;  %v349_v22 = vmul.f32 %v1351_v45, %v1351_v45  ;;  %v1369_v54 = vsub.f32 %v1251_v47, %v1279_v5  ;;  %v350_v29 = vmul.f32 %v1357_v48, %v1357_v48 }
  0xfb   :  { %v361_v28 = vadd.f32 %v360_v27, %v340_v26  ;;  %v264_v57 = vsub.f32 %v1208_v20, %v1279_v5  ;;  %v351_v38 = vmul.f32 %v1363_v52, %v1363_v52  ;;  %v265_v59 = vsub.f32 %v1216_v24, %v1279_v5 }
  0xfc   :  { %v352_v47 = vmul.f32 %v1369_v54, %v1369_v54  ;;  %v266_v62 = vsub.f32 %v1228_v32, %v1279_v5  ;;  %v268_v20 = vsub.f32 %v1257_v50, %v1279_v5  ;;  %v267_v1 = vsub.f32 %v1239_v40, %v1279_v5 }
  0xfd   :  { %v362_v33 = vadd.f32 %v361_v28, %v341_v16  ;;  %v353_v63 = vmul.f32 %v264_v57, %v264_v57  ;;  %v354_v2 = vmul.f32 %v265_v59, %v265_v59 }
  0xfe   :  { %v355_v24 = vmul.f32 %v266_v62, %v266_v62  ;;  %v335_v9 = vsel %vm313_vm1, %v268_v20, 0.0  ;;  %v356_v10 = vmul.f32 %v267_v1, %v267_v1 }
  0xff   :  { %v363_v35 = vadd.f32 %v362_v33, %v342_v18  ;;  %v357_v25 = vmul.f32 %v335_v9, %v335_v9 }
 0x101   :  { %v364_v39 = vadd.f32 %v363_v35, %v343_v21 }
 0x103   :  { %v365_v42 = vadd.f32 %v364_v39, %v344_v23 }
 0x105   :  { %v366_v44 = vadd.f32 %v365_v42, %v345_v30  ;;  %v387_v42 = vld [vmem:[%s1543_s2] sm:$0x1] }
 0x107   :  { %v367_v46 = vadd.f32 %v366_v44, %v346_v36 }
 0x109   :  { %v368_v51 = vadd.f32 %v367_v46, %v347_v17  ;;  %v1390_v46 = vand.u32 127, %v270_v49 }
 0x10b   :  { %v369_v53 = vadd.f32 %v368_v51, %v348_v19  ;;  %vm481_vm5 = vcmp.ge.s32.totalorder %v1390_v46, 16  ;;  %vm482_vm6 = vcmp.lt.s32.totalorder %v1390_v46, 32  ;;  %vm474_vm7 = vcmp.lt.s32.totalorder %v1390_v46, 16 }
 0x10c   :  { %vm505_vm8 = vcmp.ge.s32.totalorder %v1390_v46, 32  ;;  %vm506_vm9 = vcmp.lt.s32.totalorder %v1390_v46, 48  ;;  %vm529_vm10 = vcmp.ge.s32.totalorder %v1390_v46, 48  ;;  %vm530_vm11 = vcmp.lt.s32.totalorder %v1390_v46, 64  ;;  %vm483_vm12 = vmand %vm481_vm5, %vm482_vm6 }
 0x10d   :  { %v370_v56 = vadd.f32 %v369_v53, %v349_v22  ;;  %vm1425_vm13 = vmpackc.low %vm474_vm7, %vm474_vm7 }
 0x10e   :  { %vm507_vm14 = vmand %vm505_vm8, %vm506_vm9 }
 0x10f   :  { %v371_v58 = vadd.f32 %v370_v56, %v350_v29  ;;  %v1053_v29 = vld [vmem:[%s1544_s3] ss:$0 sm:$0xff]  ;;  %vm1433_vm15 = vmpackc.low %vm483_vm12, %vm483_vm12 }
 0x110   :  { %vm1445_vm0 = vmpackc.low %vm507_vm14, %vm507_vm14 }
 0x111   :  { %v372_v61 = vadd.f32 %v371_v58, %v351_v38  ;;  %vm531_vm1 = vmand %vm529_vm10, %vm530_vm11 }
 0x113   :  { %v373_v0 = vadd.f32 %v372_v61, %v352_v47 }
 0x115   :  { %v374_v3 = vadd.f32 %v373_v0, %v353_v63 }
 0x117   :  { %v375_v4 = vadd.f32 %v374_v3, %v354_v2 }
 0x119   :  { %v376_v13 = vadd.f32 %v375_v4, %v355_v24 }
 0x11b   :  { %v377_v26 = vadd.f32 %v376_v13, %v356_v10 }
 0x11d   :  { %v378_v27 = vadd.f32 %v377_v26, %v357_v25 }
 0x11f   :  { %v380_v32 = vrot.slane %v378_v27, 4 }
 0x121   :  { %v381_v16 = vadd.f32 %v380_v32, %v378_v27 }
 0x123   :  { %v382_v28 = vrot.slane %v381_v16, 2 }
 0x125   :  { %v383_v18 = vadd.f32 %v382_v28, %v381_v16 }
 0x127   :  { %v384_v33 = vrot.slane %v383_v18, 1 }
 0x129   :  { %v385_v50 = vadd.f32 %v384_v33, %v383_v18 }
 0x12b   :  { %v386_v21 = vmul.f32 0.0061728396, %v385_v50 }
 0x12d   :  { %v388_v35 = vadd.f32 1e-05, %v386_v21 }
 0x12f   :  { %1057 = vrsqrt.f32 %v388_v35  ;;  %vm395_vm3 = vweird.f32 %v388_v35 }
 0x135   :  { %v1058_v40 = vpop.eup %1057 }
 0x136   :  { %v390_v5 = vmul.f32 %v1058_v40, %v388_v35  ;;  %vm396_vm2 = vweird.f32 %v1058_v40 }
 0x137   :  { %vm397_vm4 = vmor %vm395_vm3, %vm396_vm2  ;;  %vm597_vm3 = vcmask 1041409  }
 0x138   :  { %v391_v23 = vmul.f32 %v1058_v40, %v390_v5  ;;  %vm1469_vm2 = vmpackc.low %vm531_vm1, %vm531_vm1 }
 0x13a   :  { %v392_v39 = vmul.f32 0.5, %v391_v23 }
 0x13c   :  { %v393_v30 = vsub.f32 1.5, %v392_v39 }
 0x13e   :  { %v394_v36 = vmul.f32 %v1058_v40, %v393_v30 }
 0x140   :  { %v398_v44 = vsel %vm397_vm4, %v1058_v40, %v394_v36  ;;  %vm828_vm4 = vcmask 1041408  }
 0x141   :  { %v399_v17 = vmul.f32 %v398_v44, %v387_v42 }
 0x143   :  { %v401_v19 = vperm.slane %v399_v17, 0 }
 0x145   :  { %v403_v51 = vmul.f32 %v401_v19, %v1283_v6  ;;  %v404_v22 = vmul.f32 %v401_v19, %v1287_v7  ;;  %v405_v53 = vmul.f32 %v401_v19, %v1291_v8  ;;  %v406_v55 = vmul.f32 %v401_v19, %v1299_v11 }
 0x146   :  { %v407_v49 = vmul.f32 %v401_v19, %v1303_v12  ;;  %v408_v56 = vmul.f32 %v401_v19, %v1309_v14  ;;  %v409_v6 = vmul.f32 %v401_v19, %v1315_v15  ;;  %v410_v7 = vmul.f32 %v401_v19, %v1321_v31 }
 0x147   :  { %v411_v8 = vmul.f32 %v401_v19, %v1327_v34  ;;  %v412_v11 = vmul.f32 %v401_v19, %v1333_v37  ;;  %v413_v57 = vmul.f32 %v401_v19, %v1339_v41  ;;  %v414_v38 = vmul.f32 %v401_v19, %v1345_v43 }
 0x148   :  { %v415_v12 = vmul.f32 %v401_v19, %v1351_v45  ;;  %v416_v14 = vmul.f32 %v401_v19, %v1357_v48  ;;  %v417_v15 = vmul.f32 %v401_v19, %v1363_v52  ;;  %v418_v31 = vmul.f32 %v401_v19, %v1369_v54 }
 0x149   :  { %v423_v58 = vadd.f32 %v1053_v29, %v403_v51  ;;  %v424_v34 = vadd.f32 %v1053_v29, %v404_v22  ;;  %v425_v59 = vadd.f32 %v1053_v29, %v405_v53  ;;  %v426_v37 = vadd.f32 %v1053_v29, %v406_v55 }
 0x14a   :  { %v427_v60 = vadd.f32 %v1053_v29, %v407_v49  ;;  %v428_v41 = vadd.f32 %v1053_v29, %v408_v56  ;;  %v429_v47 = vadd.f32 %v1053_v29, %v409_v6  ;;  %v430_v43 = vadd.f32 %v1053_v29, %v410_v7 }
 0x14b   :  { %v431_v61 = vadd.f32 %v1053_v29, %v411_v8  ;;  %v432_v62 = vadd.f32 %v1053_v29, %v412_v11  ;;  %v433_v63 = vadd.f32 %v1053_v29, %v413_v57  ;;  %v434_v0 = vadd.f32 %v1053_v29, %v414_v38 }
 0x14c   :  { %v435_v45 = vadd.f32 %v1053_v29, %v415_v12  ;;  %v436_v48 = vadd.f32 %v1053_v29, %v416_v14  ;;  %v437_v52 = vadd.f32 %v1053_v29, %v417_v15  ;;  %v438_v54 = vadd.f32 %v1053_v29, %v418_v31 }
 0x14d   :  { %v439_v20 = vmax.f32 %v423_v58, 0.0  ;;  %v440_v1 = vmax.f32 %v424_v34, 0.0  ;;  %v441_v2 = vmax.f32 %v425_v59, 0.0  ;;  %v442_v3 = vmax.f32 %v426_v37, 0.0 }
 0x14e   :  { %v443_v24 = vmax.f32 %v427_v60, 0.0  ;;  %v444_v4 = vmax.f32 %v428_v41, 0.0  ;;  %v445_v9 = vmax.f32 %v429_v47, 0.0  ;;  %v446_v10 = vmax.f32 %v430_v43, 0.0  ;;  %v1046_v43 = vld [vmem:[%s1549_s8 + $0x20] sm:$0xff] }
 0x14f   :  { %v447_v13 = vmax.f32 %v431_v61, 0.0  ;;  %v448_v25 = vmax.f32 %v432_v62, 0.0  ;;  %v449_v26 = vmax.f32 %v433_v63, 0.0  ;;  %v450_v27 = vmax.f32 %v434_v0, 0.0 }
 0x150   :  { %v451_v32 = vmax.f32 %v435_v45, 0.0  ;;  %v452_v16 = vmax.f32 %v436_v48, 0.0  ;;  %v453_v28 = vmax.f32 %v437_v52, 0.0  ;;  %v454_v18 = vmax.f32 %v438_v54, 0.0 }
 0x151   :  { %v455_v33 = vpack.c.bf16 %v439_v20, %v439_v20  ;;  %v456_v50 = vpack.c.bf16 %v440_v1, %v440_v1  ;;  %v457_v21 = vpack.c.bf16 %v441_v2, %v441_v2  ;;  %v458_v35 = vpack.c.bf16 %v442_v3, %v442_v3  ;;  %v1041_v20 = vld [vmem:[%s1547_s6 + $0x38] sm:$0xff] }
 0x152   :  { %v459_v5 = vpack.c.bf16 %v443_v24, %v443_v24  ;;  %v460_v23 = vpack.c.bf16 %v444_v4, %v444_v4  ;;  %v461_v39 = vpack.c.bf16 %v445_v9, %v445_v9  ;;  %v462_v30 = vpack.c.bf16 %v446_v10, %v446_v10  ;;  %732 = vmatpush.bf16.msrb.mxu2 %v1041_v20  ;;  %v1043_v20 = vld [vmem:[%s1549_s8 + $0x8] sm:$0xff] }
 0x153   :  { %v463_v42 = vpack.c.bf16 %v447_v13, %v447_v13  ;;  %v464_v36 = vpack.c.bf16 %v448_v25, %v448_v25  ;;  %v465_v44 = vpack.c.bf16 %v449_v26, %v449_v26  ;;  %v466_v17 = vpack.c.bf16 %v450_v27, %v450_v27  ;;  %v1040_v25 = vld [vmem:[%s1547_s6 + $0x30] sm:$0xff] }
 0x154   :  { %v467_v51 = vpack.c.bf16 %v451_v32, %v451_v32  ;;  %v468_v22 = vpack.c.bf16 %v452_v16, %v452_v16  ;;  %v469_v53 = vpack.c.bf16 %v453_v28, %v453_v28  ;;  %v470_v55 = vpack.c.bf16 %v454_v18, %v454_v18 }
 0x155   :  { %v477_v29 = vsel %vm1425_vm13, %v455_v33, 0  ;;  %v478_v49 = vsel %vm1425_vm13, %v456_v50, 0  ;;  %v479_v56 = vsel %vm1425_vm13, %v457_v21, 0  ;;  %v480_v6 = vsel %vm1425_vm13, %v458_v35, 0  ;;  %v1039_v21 = vld [vmem:[%s1547_s6 + $0x28] sm:$0xff] }
 0x156   :  { %v485_v8 = vsel %vm1433_vm15, %v459_v5, 0  ;;  %v486_v11 = vsel %vm1433_vm15, %v460_v23, 0  ;;  %v487_v57 = vsel %vm1433_vm15, %v461_v39, 0  ;;  %v488_v38 = vsel %vm1433_vm15, %v462_v30, 0  ;;  %733 = vmatpush.bf16.msrb.mxu2 %v1040_v25 }
 0x157   :  { %v489_v12 = vunpack.c.l.bf16 %v477_v29  ;;  %v490_v14 = vunpack.c.l.bf16 %v478_v49  ;;  %v491_v15 = vunpack.c.l.bf16 %v479_v56  ;;  %v492_v31 = vunpack.c.l.bf16 %v480_v6  ;;  %v1036_v6 = vld [vmem:[%s1547_s6 + $0x10] sm:$0xff] }
 0x158   :  { %v493_v58 = vunpack.c.l.bf16 %v485_v8  ;;  %v494_v34 = vunpack.c.l.bf16 %v486_v11  ;;  %v495_v59 = vunpack.c.l.bf16 %v487_v57  ;;  %v496_v37 = vunpack.c.l.bf16 %v488_v38  ;;  %v1035_v38 = vld [vmem:[%s1547_s6 + $0x8] sm:$0xff] }
 0x159   :  { %v509_v60 = vsel %vm1445_vm0, %v463_v42, 0  ;;  %v510_v41 = vsel %vm1445_vm0, %v464_v36, 0  ;;  %v511_v47 = vsel %vm1445_vm0, %v465_v44, 0  ;;  %v512_v46 = vsel %vm1445_vm0, %v466_v17, 0  ;;  %v1038_v44 = vld [vmem:[%s1547_s6 + $0x20] sm:$0xff] }
 0x15a   :  { %v497_v61 = vmax.f32 %v489_v12, %v493_v58  ;;  %v498_v62 = vmax.f32 %v490_v14, %v494_v34  ;;  %v499_v63 = vmax.f32 %v491_v15, %v495_v59  ;;  %v500_v0 = vmax.f32 %v492_v31, %v496_v37  ;;  %734 = vmatpush.bf16.msrb.mxu2 %v1039_v21 }
 0x15b   :  { %v517_v45 = vunpack.c.l.bf16 %v509_v60  ;;  %v518_v48 = vunpack.c.l.bf16 %v510_v41  ;;  %v519_v52 = vunpack.c.l.bf16 %v511_v47  ;;  %v520_v54 = vunpack.c.l.bf16 %v512_v46  ;;  %v1034_v60 = vld [vmem:[%s1547_s6] sm:$0xff]  ;;  %v1049_v41 = vld [vmem:[%s1549_s8 + $0x38] sm:$0xff]  ;;  %v1048_v47 = vld [vmem:[%s1549_s8 + $0x30] sm:$0xff] }
 0x15c   :  { %v533_v1 = vsel %vm1469_vm2, %v467_v51, 0  ;;  %v534_v2 = vsel %vm1469_vm2, %v468_v22, 0  ;;  %v535_v3 = vsel %vm1469_vm2, %v469_v53, 0  ;;  %v536_v24 = vsel %vm1469_vm2, %v470_v55, 0  ;;  %v1037_v53 = vld [vmem:[%s1547_s6 + $0x18] sm:$0xff]  ;;  %815 = vmatpush.bf16.msra.mxu3 %v1049_v41  ;;  %v1047_v46 = vld [vmem:[%s1549_s8 + $0x28] sm:$0xff] }
 0x15d   :  { %v521_v4 = vmax.f32 %v497_v61, %v517_v45  ;;  %v522_v9 = vmax.f32 %v498_v62, %v518_v48  ;;  %v523_v10 = vmax.f32 %v499_v63, %v519_v52  ;;  %v524_v13 = vmax.f32 %v500_v0, %v520_v54  ;;  %v1045_v61 = vld [vmem:[%s1549_s8 + $0x18] sm:$0xff]  ;;  %v1044_v62 = vld [vmem:[%s1549_s8 + $0x10] sm:$0xff]  ;;  %v1054_v63 = vld [vmem:[%s1546_s5] ss:$0 sm:$0xff] }
 0x15e   :  { %v541_v26 = vunpack.c.l.bf16 %v533_v1  ;;  %v542_v27 = vunpack.c.l.bf16 %v534_v2  ;;  %v543_v32 = vunpack.c.l.bf16 %v535_v3  ;;  %v544_v16 = vunpack.c.l.bf16 %v536_v24  ;;  %735 = vmatpush.bf16.msrb.mxu2 %v1038_v44  ;;  %v1042_v1 = vld [vmem:[%s1549_s8] sm:$0xff] }
 0x15f   :  { %v1055_v2 = vld [vmem:[%s1548_s7] ss:$0 sm:$0xff]  ;;  %s1089_s7 = smov [#allocation2]  }
 0x160   :  { %v545_v28 = vmax.f32 %v521_v4, %v541_v26  ;;  %v546_v18 = vmax.f32 %v522_v9, %v542_v27  ;;  %v547_v33 = vmax.f32 %v523_v10, %v543_v32  ;;  %v548_v50 = vmax.f32 %v524_v13, %v544_v16  ;;  %816 = vmatpush.bf16.msra.mxu3 %v1048_v47  ;;  %v1056_v13 = vld [vmem:[%s1550_s9] ss:$0 sm:$0xff]  ;;  %s848_s8 = sshll.u32 %s1089_s7, 4  ;;  %s849_s8 = int_to_ptr.vmem [resolvable:$true] %s848_s8 }
 0x162   :  { %v549_v35 = vpack.c.bf16 %v545_v28, %v545_v28  ;;  %v550_v40 = vpack.c.bf16 %v546_v18, %v546_v18  ;;  %v551_v5 = vpack.c.bf16 %v547_v33, %v547_v33  ;;  %v552_v23 = vpack.c.bf16 %v548_v50, %v548_v50  ;;  %736 = vmatpush.bf16.msrb.mxu2 %v1037_v53 }
 0x164   :  { %v553_v39 = vunpack.c.l.bf16 %v549_v35  ;;  %v554_v30 = vunpack.c.l.bf16 %v550_v40  ;;  %v555_v42 = vunpack.c.l.bf16 %v551_v5  ;;  %v556_v36 = vunpack.c.l.bf16 %v552_v23  ;;  %817 = vmatpush.bf16.msra.mxu3 %v1047_v46 }
 0x166   :  { %v557_v17 = vmax.f32 %v553_v39, %v554_v30  ;;  %v564_v19 = vmax.f32 %v555_v42, %v556_v36  ;;  %737 = vmatpush.bf16.msrb.mxu2 %v1036_v6 }
 0x168   :  { %v558_v51 = vrot.slane %v557_v17, 4  ;;  %v565_v22 = vrot.slane %v564_v19, 4  ;;  %818 = vmatpush.bf16.msra.mxu3 %v1046_v43 }
 0x16a   :  { %v559_v55 = vmax.f32 %v557_v17, %v558_v51  ;;  %v566_v29 = vmax.f32 %v564_v19, %v565_v22  ;;  %738 = vmatpush.bf16.msrb.mxu2 %v1035_v38 }
 0x16c   :  { %v560_v49 = vrot.slane %v559_v55, 2  ;;  %v567_v56 = vrot.slane %v566_v29, 2  ;;  %819 = vmatpush.bf16.msra.mxu3 %v1045_v61 }
 0x16e   :  { %v561_v7 = vmax.f32 %v559_v55, %v560_v49  ;;  %v568_v8 = vmax.f32 %v566_v29, %v567_v56  ;;  %739 = vmatpush.bf16.msrb.mxu2 %v1034_v60 }
 0x170   :  { %v562_v11 = vrot.slane %v561_v7, 1  ;;  %v569_v57 = vrot.slane %v568_v8, 1  ;;  %820 = vmatpush.bf16.msra.mxu3 %v1044_v62 }
 0x172   :  { %v563_v12 = vmax.f32 %v561_v7, %v562_v11  ;;  %v570_v14 = vmax.f32 %v568_v8, %v569_v57 }
 0x174   :  { %v571_v15 = vpack.c.bf16 %v563_v12, %v563_v12  ;;  %v572_v31 = vpack.c.bf16 %v570_v14, %v570_v14  ;;  %821 = vmatpush.bf16.msra.mxu3 %v1043_v20 }
 0x176   :  { %v595_v58 = vunpack.c.l.b16 %v571_v15  ;;  %v596_v34 = vunpack.c.l.b16 %v572_v31 }
 0x178   :  { %v598_v59 = vsel %vm597_vm3, %v596_v34, %v595_v58  ;;  %822 = vmatpush.bf16.msra.mxu3 %v1042_v1 }
 0x179   :  { %v599_v37 = vpack.c.b16 %v598_v59, %v598_v59 }
 0x17b   :  { %657 = vmatmul.bf16.vlgmr.msrb.gmra.mxu1 %v599_v37 }
 0x1f8   :  { %v658_v0 = vpop.f32.mrf.mxu1 }
 0x1f9   :  { %v659_v45 = vadd.f32 %v1054_v63, %v658_v0 }
 0x1fb   :  { %v662_v48 = vmax.f32 %v659_v45, 0.0 }
 0x1fd   :  { %v663_v52 = vpack.c.bf16 %v662_v48, %v662_v48 }
 0x1ff   :  { %740 = vmatmul.bf16.vlgmr.msrb.gmra.mxu2 %v663_v52 }
 0x200   :  { %v660_v54 = vpop.f32.mrf.mxu1 }
 0x282   :  { %v741_v3 = vpop.f32.mrf.mxu2 }
 0x283   :  { %v742_v24 = vadd.f32 %v1055_v2, %v741_v3 }
 0x285   :  { %v745_v4 = vmax.f32 %v742_v24, 0.0 }
 0x287   :  { %v746_v9 = vpack.c.bf16 %v745_v4, %v745_v4 }
 0x289   :  { %823 = vmatmul.bf16.vlgmr.msra.gmra.mxu3 %v746_v9 }
 0x28a   :  { %v743_v10 = vpop.f32.mrf.mxu2 }
 0x30c   :  { %v824_v25 = vpop.f32.mrf.mxu3 }
 0x30d   :  { %v825_v26 = vadd.f32 %v1056_v13, %v824_v25 }
 0x30f   :  { %v829_v27 = vsel %vm828_vm4, %v825_v26, -inf }
 0x310   :  { %830 = vmax.xlane.f32.xlu0 %v829_v27 }
 0x314   :  { %v826_v32 = vpop.f32.mrf.mxu3 }
 0x383   :  { %v831_v16 = vpop.xlane.xlu0 %830 }
 0x384   :  { %v832_v28 = vsub.f32 %v825_v26, %v831_v16 }
 0x386   :  { %v833_v18 = vmul.f32 1.442695, %v832_v28 }
 0x388   :  { %1059 = vpow2.f32 %v833_v18 }
 0x38e   :  { %v1060_v33 = vpop.eup %1059 }
 0x38f   :  { %v835_v50 = vsel %vm828_vm4, %v1060_v33, 0.0 }
 0x390   :  { %836 = vadd.xlane.f32.xlu0 %v835_v50 }
 0x403   :  { %v837_v21 = vpop.xlane.xlu0 %836 }
 0x404   :  { %1061 = vlog2.f32 %v837_v21 }
 0x40a   :  { %v1062_v35 = vpop.eup %1061 }
 0x40b   :  { %v839_v40 = vmul.f32 0.6931472, %v1062_v35 }
 0x40d   :  { %v840_v5 = vadd.f32 %v839_v40, %v831_v16 }
 0x40f   :  { %v841_v23 = vsub.f32 %v825_v26, %v840_v5 }
 0x411   :  { %842 = vst [vmem:[#allocation2] sm:$0x3] %v841_v23 }
 0x412   :  { %853 = dma.vmem_to_hbm [thread:$0]  %s849_s8, 32, %s851_s21, [#allocation3]  }
 0x413   :  { %1087 = dma.done.wait [#allocation3], 32  }
 0x414   :  { %1088 = vsyncadd [#allocation3], 4294967264 }
 0x415   :  { %858 = vsyncpa [#allocation3], 1 }

</bundles_post_ra>
